<compile_context>
chip_gen: v6e
topology: v6e:2x2x1
jax: 0.10.0
libtpu: 0.0.40
codegen_flags: <defaults>
</compile_context>

<pallas_src>
import functools

import jax
import jax.numpy as jnp
from jax.experimental import pallas as pl
from jax.experimental.pallas import tpu as pltpu


def _ps_upsample_kernel(x_ref, w_ref, b_ref, o_ref):
    # x_ref: (1, TM, C)   input pixels (channels-last)
    # w_ref: (C, 4*Co)    pointwise conv weight, columns ordered (dh, dw, co)
    # b_ref: (1, 4*Co)    bias in the same column order
    # o_ref: (1, TM, 4*Co)
    y = jnp.dot(x_ref[0], w_ref[...], preferred_element_type=jnp.float32)
    y = y + b_ref[...]                      # broadcast (1, 4Co) over rows
    y = y * jax.nn.sigmoid(y)               # SiLU (EUP transcendental)
    o_ref[0] = y.astype(o_ref.dtype)


def _pick_row_tile(hw, c_in, c_out4, bytes_per_elem=4, budget=8 << 20):
    """Largest power-of-two row tile (multiple of 8) dividing hw that keeps the
    double-buffered in+out blocks well under the scoped-VMEM budget
    (conservative enough for v7x's 64 MiB / 32 MiB default limit)."""
    for tm in (4096, 2048, 1024, 512, 256, 128, 64, 32, 16, 8):
        if hw % tm == 0 and 2 * tm * (c_in + c_out4) * bytes_per_elem <= budget:
            return tm
    return hw   # full extent (bypasses the (8,128) block constraint)


def pixel_shuffle_upsample_forward(x, weight, bias):
    """x: (B, C, F, H, W); weight: (4*Co, C, 1, 1, 1); bias: (4*Co,)
    returns (B, Co, F, 2H, 2W) — identical semantics to the PyTorch module."""
    B, C, F, H, W = x.shape
    CO4 = weight.shape[0]
    Co = CO4 // 4
    N = B * F
    HW = H * W

    # --- single input relayout: NCFHW -> (B*F, H*W, C) channels-last rows ---
    x_rows = jnp.transpose(x, (0, 2, 3, 4, 1)).reshape(N, HW, C)

    # --- weight/bias prep: reorder output channels (co,dh,dw) -> (dh,dw,co) ---
    # so matmul output columns are already grouped for the pixel shuffle.
    w2 = weight.reshape(Co, 2, 2, C)                     # [co, dh, dw, ci]
    w_mat = jnp.transpose(w2, (1, 2, 0, 3)).reshape(CO4, C).T        # (C, 4Co)
    b_mat = jnp.transpose(bias.reshape(Co, 2, 2), (1, 2, 0)).reshape(1, CO4)

    TM = _pick_row_tile(HW, C, CO4, jnp.dtype(x.dtype).itemsize)
    grid = (N, HW // TM)

    itemsize = jnp.dtype(x.dtype).itemsize
    cost = pl.CostEstimate(
        flops=2 * N * HW * C * CO4,
        transcendentals=N * HW * CO4,
        bytes_accessed=(N * HW * C + N * HW * CO4 + C * CO4 + CO4) * itemsize,
    )

    y = pl.pallas_call(
        _ps_upsample_kernel,
        out_shape=jax.ShapeDtypeStruct((N, HW, CO4), x.dtype),
        grid_spec=pltpu.PrefetchScalarGridSpec(
            num_scalar_prefetch=0,
            grid=grid,
            in_specs=[
                pl.BlockSpec((1, TM, C), lambda n, m: (n, m, 0)),
                pl.BlockSpec((C, CO4), lambda n, m: (0, 0)),   # resident weight
                pl.BlockSpec((1, CO4), lambda n, m: (0, 0)),   # resident bias
            ],
            out_specs=pl.BlockSpec((1, TM, CO4), lambda n, m: (n, m, 0)),
        ),
        compiler_params=pltpu.CompilerParams(
            dimension_semantics=("parallel", "parallel")),
        cost_estimate=cost,
    )(x_rows, w_mat, b_mat)

    # --- pixel shuffle folded into the single mandatory layout conversion back
    # to PyTorch NCDHW: columns are (dh, dw, co), so this is pure index
    # permutation (one XLA transpose pass, no extra compute). ---
    y = y.reshape(B, F, H, W, 2, 2, Co)                  # [b, f, h, w, dh, dw, co]
    out = jnp.transpose(y, (0, 6, 1, 2, 4, 3, 5))        # [b, co, f, h, dh, w, dw]
    return out.reshape(B, Co, F, 2 * H, 2 * W)


def _reference(x, weight, bias):
    """Pure-JAX reference matching the PyTorch module exactly."""
    B, C, F, H, W = x.shape
    CO4 = weight.shape[0]
    Co = CO4 // 4
    w = weight.reshape(CO4, C)
    y = jnp.einsum("oc,bcfhw->bofhw", w, x) + bias[None, :, None, None, None]
    y = jax.nn.silu(y)
    # rearrange 'b c f h w -> (b f) c h w'
    y = jnp.transpose(y, (0, 2, 1, 3, 4)).reshape(B * F, CO4, H, W)
    # nn.PixelShuffle(2)
    y = y.reshape(B * F, Co, 2, 2, H, W)
    y = jnp.transpose(y, (0, 1, 4, 2, 5, 3)).reshape(B * F, Co, 2 * H, 2 * W)
    # rearrange '(b f) c h w -> b c f h w'
    return jnp.transpose(y.reshape(B, F, Co, 2 * H, 2 * W), (0, 2, 1, 3, 4))


if __name__ == "__main__":
    key = jax.random.PRNGKey(0)
    kx, kw, kb = jax.random.split(key, 3)

    # Small shapes consistent with the module: PixelShuffleUpsample(dim=4),
    # input video tensor (batch=2, channels=4, frames=2, 16x16 spatial).
    B, C, F, H, W = 2, 4, 2, 16, 16
    Co = C                                   # dim_out defaults to dim
    x = jax.random.normal(kx, (B, C, F, H, W), dtype=jnp.float32)
    weight = jax.random.normal(kw, (4 * Co, C, 1, 1, 1), dtype=jnp.float32) * 0.1
    bias = jax.random.normal(kb, (4 * Co,), dtype=jnp.float32) * 0.1

    out = jax.block_until_ready(pixel_shuffle_upsample_forward(x, weight, bias))
    ref = jax.block_until_ready(_reference(x, weight, bias))

    assert out.shape == (B, Co, F, 2 * H, 2 * W)
    assert jnp.allclose(out, ref, atol=1e-4, rtol=1e-4)
    print("KERNEL_OK")
</pallas_src>

<mosaic_0001>
module attributes {stable_mosaic.version = 11 : i64} {
  func.func @_ps_upsample_kernel(%arg0: i32, %arg1: i32, %arg2: memref<1x256x4xf32, #tpu.memory_space<vmem>>, %arg3: memref<4x16xf32, #tpu.memory_space<vmem>>, %arg4: memref<1x16xf32, #tpu.memory_space<vmem>>, %arg5: memref<1x256x16xf32, #tpu.memory_space<vmem>>) attributes {dimension_semantics = [#tpu.dimension_semantics<parallel>, #tpu.dimension_semantics<parallel>], iteration_bounds = array<i64: 4, 1>, scalar_prefetch = 0 : i64, scratch_operands = 0 : i64, tpu.core_type = #tpu.core_type<tc>, window_params = [{transform_indices = @transform_0, window_bounds = array<i64: 1, 256, 4>}, {pipeline_mode = #tpu.pipeline_mode<synchronous>, transform_indices = @transform_1, window_bounds = array<i64: 4, 16>}, {pipeline_mode = #tpu.pipeline_mode<synchronous>, transform_indices = @transform_2, window_bounds = array<i64: 1, 16>}, {transform_indices = @transform_3, window_bounds = array<i64: 1, 256, 16>}]} {
    %c0 = arith.constant 0 : index
    %c0_0 = arith.constant 0 : index
    %c0_1 = arith.constant 0 : index
    %0 = vector.load %arg2[%c0, %c0_0, %c0_1] : memref<1x256x4xf32, #tpu.memory_space<vmem>>, vector<1x256x4xf32>
    %1 = vector.shape_cast %0 : vector<1x256x4xf32> to vector<256x4xf32>
    %c0_2 = arith.constant 0 : index
    %c0_3 = arith.constant 0 : index
    %2 = vector.load %arg3[%c0_2, %c0_3] : memref<4x16xf32, #tpu.memory_space<vmem>>, vector<4x16xf32>
    %cst = arith.constant dense<0.000000e+00> : vector<256x16xf32>
    %3 = tpu.matmul %1, %2, %cst {dimension_numbers = #tpu.dot_dimension_numbers<[1], [0], [0], [1], [0, 0, 1, 1], [], []>} : vector<256x4xf32>, vector<4x16xf32>, vector<256x16xf32> -> vector<256x16xf32>
    %c0_4 = arith.constant 0 : index
    %c0_5 = arith.constant 0 : index
    %4 = vector.load %arg4[%c0_4, %c0_5] : memref<1x16xf32, #tpu.memory_space<vmem>>, vector<1x16xf32>
    %5 = vector.broadcast %4 : vector<1x16xf32> to vector<256x16xf32>
    %6 = arith.addf %3, %5 : vector<256x16xf32>
    %7 = arith.negf %6 : vector<256x16xf32>
    %8 = math.exp %7 : vector<256x16xf32>
    %cst_6 = arith.constant 1.000000e+00 : f32
    %9 = vector.broadcast %cst_6 : f32 to vector<256x16xf32>
    %10 = arith.addf %9, %8 : vector<256x16xf32>
    %11 = arith.divf %9, %10 : vector<256x16xf32>
    %12 = arith.mulf %6, %11 : vector<256x16xf32>
    %c0_7 = arith.constant 0 : index
    %c0_8 = arith.constant 0 : index
    %c0_9 = arith.constant 0 : index
    %13 = vector.load %arg5[%c0_7, %c0_8, %c0_9] : memref<1x256x16xf32, #tpu.memory_space<vmem>>, vector<1x256x16xf32>
    %14 = vector.shape_cast %13 : vector<1x256x16xf32> to vector<256x16xf32>
    %15 = vector.shape_cast %12 : vector<256x16xf32> to vector<1x256x16xf32>
    tpu.vector_store %arg5[%c0_7, %c0_8, %c0_9], %15 {strides = array<i32>} : memref<1x256x16xf32, #tpu.memory_space<vmem>>, vector<1x256x16xf32>,
    return
  }
  func.func @transform_0(%arg0: i32, %arg1: i32) -> (i32, i32, i32) {
    %c0_i32 = arith.constant 0 : i32
    %c0_i32_0 = arith.constant 0 : i32
    return %arg0, %arg1, %c0_i32 : i32, i32, i32
  }
  func.func @transform_1(%arg0: i32, %arg1: i32) -> (i32, i32) {
    %c0_i32 = arith.constant 0 : i32
    %c0_i32_0 = arith.constant 0 : i32
    %c0_i32_1 = arith.constant 0 : i32
    return %c0_i32, %c0_i32_0 : i32, i32
  }
  func.func @transform_2(%arg0: i32, %arg1: i32) -> (i32, i32) {
    %c0_i32 = arith.constant 0 : i32
    %c0_i32_0 = arith.constant 0 : i32
    %c0_i32_1 = arith.constant 0 : i32
    return %c0_i32, %c0_i32_0 : i32, i32
  }
  func.func @transform_3(%arg0: i32, %arg1: i32) -> (i32, i32, i32) {
    %c0_i32 = arith.constant 0 : i32
    %c0_i32_0 = arith.constant 0 : i32
    return %arg0, %arg1, %c0_i32 : i32, i32, i32
  }
}

</mosaic_0001>

<bundles_post_ra>
// kernel: tpu_custom_call.1
= control target key start
LH: loop header
LB: loop body
LE: loop exit
PB: predicated region body
PF: predicated region fallthrough
CT: control target
= control target key end

     0   :  { %s1280_s12 = smov 0   ;;  %s1282_s13 = smov 0   ;;  %s1620_s0 = inlined_call_operand.vmem [shape: f32[4,256,4], index: 0, kind: input, shape index: {}]   ;;  %s1621_s1 = inlined_call_operand.vmem [shape: f32[4,16], index: 1, kind: input, shape index: {}]   ;;  %s1622_s2 = inlined_call_operand.vmem [shape: f32[1,16], index: 2, kind: input, shape index: {}]   ;;  %s1623_s3 = inlined_call_operand.vmem [shape: f32[4,256,16], index: 3, kind: output, shape index: {}]  }
   0x1   :  { %s1284_s14 = smov 0  }
   0x2 LB: > { %s25_s15 = sadd.s32 1, %s1254_s13  ;;  %p924_p0 = scmp.ge.s32.totalorder %s1258_s14, 1  ;;  %s1258_s14 = sphi %s1284_s14, %s13_s14   ;;  %s1254_s13 = sphi %s1282_s13, %s1625_s13   ;;  %s1250_s12 = sphi %s1280_s12, %s1624_s12  }
   0x3   : > { %p27_p1 = scmp.ge.s32.totalorder %s25_s15, 4  ;;  %p158_p2 = scmp.lt.s32.totalorder %s1258_s14, 5 }
   0x5   : > { %s1627_s15 = smov (%p27_p1, %s25_s15), 0  ;;  %p159_p3 = pnand %p924_p0, %p158_p2 }
   0x6   : > { %p191_p4 = scmp.lt.s32.totalorder (!%p159_p3), %s1250_s12, 3 }
   0x7   : > { %162 = sbr.rel (%p159_p3) target bundleno = 294 (0x126), region = 32 }
   0xc   : > { %v242_v0 = vld [vmem:[%s1621_s1] sm:$0xf]  ;;  %vm347_vm0 = vcmask 1043456   ;;  %s1629_s12 = smov (!%p191_p4, %s1250_s12), 3  ;;  %vm250_vm1 = vcmask 31744   ;;  %vm800_vm2 = vcmask 130048  }
   0xd   : > { %1032 = vmatprep.subr.msk.mxu0 %vm347_vm0, %v242_v0  ;;  %1082 = vmatprep.subr.msk.mxu1 %vm347_vm0, %v242_v0  ;;  %s997_s18 = sshll.u32 %s1629_s12, 8  ;;  %v1378_v33 = vld [vmem:[%s1622_s2] ss:$0 sm:$0xff] }
   0xe   : > { %1033 = vmatpush3.msk.msra.mxu0 %vm347_vm0, %v242_v0  ;;  %1083 = vmatpush3.msk.msra.mxu1 %vm347_vm0, %v242_v0  ;;  %s1309_s21 = scalar_lea.vmem %s1620_s0, %s997_s18  ;;  %s1465_s26 = scalar_lea.vmem %s1623_s3, %s997_s18 }
   0xf   : > { %v210_v1 = vld [vmem:[%s1309_s21] sm:$0xff]  ;;  %v211_v3 = vld [vmem:[%s1309_s21 + $0x8] sm:$0xff]  ;;  %v212_v5 = vld [vmem:[%s1309_s21 + $0x10] sm:$0xff] }
  0x10   : > { %v226_v2 = vld [vmem:[%s1309_s21 + $0x80] sm:$0xff]  ;;  %1034 = vmatprep.mubr.msk.f32.mxu0 %vm250_vm1, %v210_v1  ;;  %v227_v4 = vld [vmem:[%s1309_s21 + $0x88] sm:$0xff]  ;;  %v228_v6 = vld [vmem:[%s1309_s21 + $0x90] sm:$0xff] }
  0x11   : > { %1058 = vmatprep.mubr.msk.f32.mxu1 %vm250_vm1, %v226_v2  ;;  %1035 = vmatmul.mubr.msk.f32.vlgmr.msra.gmra.mxu0 %vm250_vm1, %v211_v3  ;;  %v213_v7 = vld [vmem:[%s1309_s21 + $0x18] sm:$0xff]  ;;  %v214_v9 = vld [vmem:[%s1309_s21 + $0x20] sm:$0xff]  ;;  %v215_v11 = vld [vmem:[%s1309_s21 + $0x28] sm:$0xff] }
  0x12   : > { %1059 = vmatmul.mubr.msk.f32.vlgmr.msra.gmra.mxu1 %vm250_vm1, %v227_v4  ;;  %1037 = vmatprep.mubr.msk.f32.mxu0 %vm250_vm1, %v212_v5  ;;  %v229_v8 = vld [vmem:[%s1309_s21 + $0x98] sm:$0xff]  ;;  %v230_v10 = vld [vmem:[%s1309_s21 + $0xa0] sm:$0xff]  ;;  %v231_v12 = vld [vmem:[%s1309_s21 + $0xa8] sm:$0xff] }
  0x13   : > { %1061 = vmatprep.mubr.msk.f32.mxu1 %vm250_vm1, %v228_v6  ;;  %v216_v13 = vld [vmem:[%s1309_s21 + $0x30] sm:$0xff]  ;;  %v217_v15 = vld [vmem:[%s1309_s21 + $0x38] sm:$0xff]  ;;  %v218_v17 = vld [vmem:[%s1309_s21 + $0x40] sm:$0xff] }
  0x14   : > { %v232_v14 = vld [vmem:[%s1309_s21 + $0xb0] sm:$0xff]  ;;  %v233_v16 = vld [vmem:[%s1309_s21 + $0xb8] sm:$0xff]  ;;  %v234_v18 = vld [vmem:[%s1309_s21 + $0xc0] sm:$0xff] }
  0x15   : > { %1038 = vmatmul.mubr.msk.f32.gmra.mxu0 %vm250_vm1, %v213_v7  ;;  %v219_v19 = vld [vmem:[%s1309_s21 + $0x48] sm:$0xff]  ;;  %v220_v21 = vld [vmem:[%s1309_s21 + $0x50] sm:$0xff]  ;;  %v221_v23 = vld [vmem:[%s1309_s21 + $0x58] sm:$0xff] }
  0x16   : > { %1062 = vmatmul.mubr.msk.f32.gmra.mxu1 %vm250_vm1, %v229_v8  ;;  %1040 = vmatprep.mubr.msk.f32.mxu0 %vm250_vm1, %v214_v9  ;;  %v235_v20 = vld [vmem:[%s1309_s21 + $0xc8] sm:$0xff]  ;;  %v236_v22 = vld [vmem:[%s1309_s21 + $0xd0] sm:$0xff]  ;;  %v237_v24 = vld [vmem:[%s1309_s21 + $0xd8] sm:$0xff] }
  0x17   : > { %1064 = vmatprep.mubr.msk.f32.mxu1 %vm250_vm1, %v230_v10  ;;  %v222_v25 = vld [vmem:[%s1309_s21 + $0x60] sm:$0xff]  ;;  %v223_v27 = vld [vmem:[%s1309_s21 + $0x68] sm:$0xff]  ;;  %v224_v29 = vld [vmem:[%s1309_s21 + $0x70] sm:$0xff] }
  0x18   : > { %v238_v26 = vld [vmem:[%s1309_s21 + $0xe0] sm:$0xff]  ;;  %v239_v28 = vld [vmem:[%s1309_s21 + $0xe8] sm:$0xff]  ;;  %v240_v30 = vld [vmem:[%s1309_s21 + $0xf0] sm:$0xff] }
  0x19   : > { %1041 = vmatmul.mubr.msk.f32.gmra.mxu0 %vm250_vm1, %v215_v11  ;;  %v225_v31 = vld [vmem:[%s1309_s21 + $0x78] sm:$0xff] }
  0x1a   : > { %1065 = vmatmul.mubr.msk.f32.gmra.mxu1 %vm250_vm1, %v231_v12  ;;  %1043 = vmatprep.mubr.msk.f32.mxu0 %vm250_vm1, %v216_v13  ;;  %v241_v32 = vld [vmem:[%s1309_s21 + $0xf8] sm:$0xff] }
  0x1b   : > { %1067 = vmatprep.mubr.msk.f32.mxu1 %vm250_vm1, %v232_v14 }
  0x1d   : > { %1044 = vmatmul.mubr.msk.f32.gmra.mxu0 %vm250_vm1, %v217_v15 }
  0x1e   : > { %1068 = vmatmul.mubr.msk.f32.gmra.mxu1 %vm250_vm1, %v233_v16  ;;  %1046 = vmatprep.mubr.msk.f32.mxu0 %vm250_vm1, %v218_v17 }
  0x1f   : > { %1070 = vmatprep.mubr.msk.f32.mxu1 %vm250_vm1, %v234_v18 }
  0x21   : > { %1047 = vmatmul.mubr.msk.f32.gmra.mxu0 %vm250_vm1, %v219_v19 }
  0x22   : > { %1071 = vmatmul.mubr.msk.f32.gmra.mxu1 %vm250_vm1, %v235_v20  ;;  %1049 = vmatprep.mubr.msk.f32.mxu0 %vm250_vm1, %v220_v21 }
  0x23   : > { %1073 = vmatprep.mubr.msk.f32.mxu1 %vm250_vm1, %v236_v22 }
  0x25   : > { %1050 = vmatmul.mubr.msk.f32.gmra.mxu0 %vm250_vm1, %v221_v23 }
  0x26   : > { %1074 = vmatmul.mubr.msk.f32.gmra.mxu1 %vm250_vm1, %v237_v24  ;;  %1052 = vmatprep.mubr.msk.f32.mxu0 %vm250_vm1, %v222_v25 }
  0x27   : > { %1076 = vmatprep.mubr.msk.f32.mxu1 %vm250_vm1, %v238_v26 }
  0x29   : > { %1053 = vmatmul.mubr.msk.f32.gmra.mxu0 %vm250_vm1, %v223_v27 }
  0x2a   : > { %1077 = vmatmul.mubr.msk.f32.gmra.mxu1 %vm250_vm1, %v239_v28  ;;  %1055 = vmatprep.mubr.msk.f32.mxu0 %vm250_vm1, %v224_v29 }
  0x2b   : > { %1079 = vmatprep.mubr.msk.f32.mxu1 %vm250_vm1, %v240_v30 }
  0x2d   : > { %1056 = vmatmul.mubr.msk.f32.gmra.mxu0 %vm250_vm1, %v225_v31 }
  0x2e   : > { %1080 = vmatmul.mubr.msk.f32.gmra.mxu1 %vm250_vm1, %v241_v32 }
  0xd1   : > { %v1036_v34 = vpop.f32.mrf.mxu0 }
  0xd2   : > { %v1060_v35 = vpop.f32.mrf.mxu1  ;;  %v1381_v36 = vadd.f32 %v1036_v34, %v1378_v33 }
  0xd3   : > { %v1384_v37 = vadd.f32 %v1060_v35, %v1378_v33  ;;  %v417_v38 = vpop.f32.mrf.mxu0 }
  0xd4   : > { %v497_v39 = vpop.f32.mrf.mxu1  ;;  %v964_v40 = vmul.f32 -1.442695, %v1381_v36  ;;  %v1389_v42 = vadd.f32 %v1378_v33, %v417_v38 }
  0xd5   : > { %v980_v41 = vmul.f32 -1.442695, %v1384_v37  ;;  %v1392_v43 = vadd.f32 %v1378_v33, %v497_v39  ;;  %v1039_v44 = vpop.f32.mrf.mxu0 }
  0xd6   : > { %v1063_v45 = vpop.f32.mrf.mxu1  ;;  %1108 = vpow2.f32 %v964_v40  ;;  %v963_v46 = vmul.f32 -1.442695, %v1389_v42  ;;  %v1397_v48 = vadd.f32 %v1039_v44, %v1378_v33 }
  0xd7   : > { %v979_v47 = vmul.f32 -1.442695, %v1392_v43  ;;  %1110 = vpow2.f32 %v980_v41  ;;  %v1400_v49 = vadd.f32 %v1063_v45, %v1378_v33  ;;  %v427_v50 = vpop.f32.mrf.mxu0 }
  0xd8   : > { %v507_v51 = vpop.f32.mrf.mxu1  ;;  %1112 = vpow2.f32 %v963_v46  ;;  %v966_v52 = vmul.f32 -1.442695, %v1397_v48  ;;  %v1404_v53 = vadd.f32 %v1378_v33, %v427_v50 }
  0xd9   : > { %v1407_v54 = vadd.f32 %v1378_v33, %v507_v51  ;;  %1114 = vpow2.f32 %v979_v47  ;;  %v982_v55 = vmul.f32 -1.442695, %v1400_v49  ;;  %v1042_v56 = vpop.f32.mrf.mxu0 }
  0xda   : > { %v1066_v57 = vpop.f32.mrf.mxu1  ;;  %1116 = vpow2.f32 %v966_v52  ;;  %v965_v58 = vmul.f32 -1.442695, %v1404_v53  ;;  %v1413_v60 = vadd.f32 %v1042_v56, %v1378_v33 }
  0xdb   : > { %v981_v59 = vmul.f32 -1.442695, %v1407_v54  ;;  %1118 = vpow2.f32 %v982_v55  ;;  %v1416_v61 = vadd.f32 %v1066_v57, %v1378_v33  ;;  %v437_v62 = vpop.f32.mrf.mxu0 }
  0xdc   : > { %v517_v63 = vpop.f32.mrf.mxu1  ;;  %1120 = vpow2.f32 %v965_v58  ;;  %v968_v0 = vmul.f32 -1.442695, %v1413_v60  ;;  %v1420_v1 = vadd.f32 %v1378_v33, %v437_v62 }
  0xdd   : > { %v1423_v2 = vadd.f32 %v1378_v33, %v517_v63  ;;  %1122 = vpow2.f32 %v981_v59  ;;  %v984_v3 = vmul.f32 -1.442695, %v1416_v61  ;;  %v1045_v4 = vpop.f32.mrf.mxu0 }
  0xde   : > { %v1069_v5 = vpop.f32.mrf.mxu1  ;;  %1124 = vpow2.f32 %v968_v0  ;;  %v967_v6 = vmul.f32 -1.442695, %v1420_v1  ;;  %v1429_v8 = vadd.f32 %v1045_v4, %v1378_v33 }
  0xdf   : > { %v983_v7 = vmul.f32 -1.442695, %v1423_v2  ;;  %1126 = vpow2.f32 %v984_v3  ;;  %v1432_v9 = vadd.f32 %v1069_v5, %v1378_v33  ;;  %v447_v10 = vpop.f32.mrf.mxu0 }
  0xe0   : > { %v527_v11 = vpop.f32.mrf.mxu1  ;;  %1128 = vpow2.f32 %v967_v6  ;;  %v970_v12 = vmul.f32 -1.442695, %v1429_v8  ;;  %v1436_v13 = vadd.f32 %v1378_v33, %v447_v10 }
  0xe1   : > { %v1439_v14 = vadd.f32 %v1378_v33, %v527_v11  ;;  %1130 = vpow2.f32 %v983_v7  ;;  %v986_v15 = vmul.f32 -1.442695, %v1432_v9  ;;  %v1048_v16 = vpop.f32.mrf.mxu0 }
  0xe2   : > { %v1072_v17 = vpop.f32.mrf.mxu1  ;;  %1132 = vpow2.f32 %v970_v12  ;;  %v969_v18 = vmul.f32 -1.442695, %v1436_v13  ;;  %v1445_v59 = vadd.f32 %v1048_v16, %v1378_v33 }
  0xe3   : > { %v985_v19 = vmul.f32 -1.442695, %v1439_v14  ;;  %v1109_v20 = vpop.eup %1108  ;;  %1134 = vpow2.f32 %v986_v15  ;;  %v457_v21 = vpop.f32.mrf.mxu0  ;;  %v1448_v3 = vadd.f32 %v1072_v17, %v1378_v33 }
  0xe4   : > { %v537_v22 = vpop.f32.mrf.mxu1  ;;  %v1111_v23 = vpop.eup %1110  ;;  %v673_v24 = vadd.f32 1.0, %v1109_v20  ;;  %1136 = vpow2.f32 %v969_v18  ;;  %v1451_v6 = vadd.f32 %v1378_v33, %v457_v21  ;;  %v972_v17 = vmul.f32 -1.442695, %v1445_v59 }
  0xe5   : > { %v1113_v25 = vpop.eup %1112  ;;  %v689_v26 = vadd.f32 1.0, %v1111_v23  ;;  %1138 = vpow2.f32 %v985_v19  ;;  %v1051_v27 = vpop.f32.mrf.mxu0  ;;  %v1454_v11 = vadd.f32 %v1378_v33, %v537_v22  ;;  %v988_v22 = vmul.f32 -1.442695, %v1448_v3 }
  0xe6   : > { %v1115_v28 = vpop.eup %1114  ;;  %1140 = vrcp.f32 %v673_v24  ;;  %v672_v29 = vadd.f32 1.0, %v1113_v25  ;;  %v1075_v30 = vpop.f32.mrf.mxu1  ;;  %v1458_v18 = vadd.f32 %v1051_v27, %v1378_v33 }
  0xe7   : > { %v1117_v31 = vpop.eup %1116  ;;  %1142 = vrcp.f32 %v689_v26  ;;  %v688_v32 = vadd.f32 1.0, %v1115_v28  ;;  %v467_v40 = vpop.f32.mrf.mxu0  ;;  %v1469_v23 = vadd.f32 %v1075_v30, %v1378_v33  ;;  %v971_v26 = vmul.f32 -1.442695, %v1451_v6 }
  0xe8   : > { %v1119_v34 = vpop.eup %1118  ;;  %1144 = vrcp.f32 %v672_v29  ;;  %v675_v35 = vadd.f32 1.0, %v1117_v31  ;;  %v547_v45 = vpop.f32.mrf.mxu1  ;;  %v1474_v27 = vadd.f32 %v1378_v33, %v467_v40  ;;  %v987_v31 = vmul.f32 -1.442695, %v1454_v11 }
  0xe9   : > { %v1121_v38 = vpop.eup %1120  ;;  %1146 = vrcp.f32 %v688_v32  ;;  %v691_v39 = vadd.f32 1.0, %v1119_v34  ;;  %v1054_v56 = vpop.f32.mrf.mxu0  ;;  %v1479_v32 = vadd.f32 %v1378_v33, %v547_v45 }
  0xea   : > { %v1123_v41 = vpop.eup %1122  ;;  %1148 = vrcp.f32 %v675_v35  ;;  %v674_v44 = vadd.f32 1.0, %v1121_v38  ;;  %v1078_v62 = vpop.f32.mrf.mxu1  ;;  %v974_v35 = vmul.f32 -1.442695, %v1458_v18  ;;  %v1486_v38 = vadd.f32 %v1054_v56, %v1378_v33 }
  0xeb   : > { %v1125_v46 = vpop.eup %1124  ;;  %1150 = vrcp.f32 %v691_v39  ;;  %v690_v47 = vadd.f32 1.0, %v1123_v41  ;;  %v477_v12 = vpop.f32.mrf.mxu0  ;;  %v990_v41 = vmul.f32 -1.442695, %v1469_v23 }
  0xec   : > { %v1127_v50 = vpop.eup %1126  ;;  %1152 = vrcp.f32 %v674_v44  ;;  %v677_v51 = vadd.f32 1.0, %v1125_v46  ;;  %v557_v19 = vpop.f32.mrf.mxu1  ;;  %v1493_v44 = vadd.f32 %v1078_v62, %v1378_v33  ;;  %v973_v46 = vmul.f32 -1.442695, %v1474_v27 }
  0xed   : > { %v1129_v52 = vpop.eup %1128  ;;  %1154 = vrcp.f32 %v690_v47  ;;  %v693_v55 = vadd.f32 1.0, %v1127_v50  ;;  %v1057_v30 = vpop.f32.mrf.mxu0  ;;  %v1500_v47 = vadd.f32 %v1378_v33, %v477_v12 }
  0xee   : > { %v1131_v57 = vpop.eup %1130  ;;  %1156 = vrcp.f32 %v677_v51  ;;  %v676_v58 = vadd.f32 1.0, %v1129_v52  ;;  %v989_v51 = vmul.f32 -1.442695, %v1479_v32  ;;  %v1507_v52 = vadd.f32 %v1378_v33, %v557_v19 }
  0xef   : > { %v1133_v63 = vpop.eup %1132  ;;  %1158 = vrcp.f32 %v693_v55  ;;  %v692_v0 = vadd.f32 1.0, %v1131_v57  ;;  %v976_v57 = vmul.f32 -1.442695, %v1486_v38 }
  0xf0   : > { %v1135_v4 = vpop.eup %1134  ;;  %1160 = vrcp.f32 %v676_v58  ;;  %v679_v5 = vadd.f32 1.0, %v1133_v63  ;;  %v1514_v58 = vadd.f32 %v1057_v30, %v1378_v33 }
  0xf1   : > { %v1137_v7 = vpop.eup %1136  ;;  %1162 = vrcp.f32 %v692_v0  ;;  %v695_v10 = vadd.f32 1.0, %v1135_v4  ;;  %v992_v0 = vmul.f32 -1.442695, %v1493_v44 }
  0xf2   : > { %v1139_v15 = vpop.eup %1138  ;;  %1164 = vrcp.f32 %v679_v5  ;;  %v678_v16 = vadd.f32 1.0, %v1137_v7  ;;  %v975_v7 = vmul.f32 -1.442695, %v1500_v47  ;;  %v978_v19 = vmul.f32 -1.442695, %v1514_v58 }
  0xf3   : > { %v1141_v20 = vpop.eup %1140  ;;  %1166 = vrcp.f32 %v695_v10  ;;  %v694_v21 = vadd.f32 1.0, %v1139_v15  ;;  %v991_v15 = vmul.f32 -1.442695, %v1507_v52 }
  0xf4   : > { %v1143_v24 = vpop.eup %1142  ;;  %v769_v25 = vmul.f32 %v1141_v20, %v1381_v36  ;;  %1168 = vrcp.f32 %v678_v16 }
  0xf5   : > { %v1145_v28 = vpop.eup %1144  ;;  %v785_v29 = vmul.f32 %v1143_v24, %v1384_v37  ;;  %1170 = vrcp.f32 %v694_v21  ;;  %v1081_v37 = vpop.f32.mrf.mxu1 }
  0xf6   : > { %v1147_v34 = vpop.eup %1146  ;;  %802 = vst.msk [vmem:[%s1465_s26 + $0x8] sm:$0xff] %vm800_vm2, %v769_v25  ;;  %v768_v36 = vmul.f32 %v1145_v28, %v1389_v42  ;;  %1172 = vpow2.f32 %v972_v17  ;;  %v1521_v4 = vadd.f32 %v1081_v37, %v1378_v33 }
  0xf7   : > { %v1149_v39 = vpop.eup %1148  ;;  %818 = vst.msk [vmem:[%s1465_s26 + $0x88] sm:$0xff] %vm800_vm2, %v785_v29  ;;  %v784_v40 = vmul.f32 %v1147_v34, %v1392_v43  ;;  %1174 = vpow2.f32 %v988_v22 }
  0xf8   : > { %v1151_v42 = vpop.eup %1150  ;;  %801 = vst.msk [vmem:[%s1465_s26] sm:$0xff] %vm800_vm2, %v768_v36  ;;  %v771_v45 = vmul.f32 %v1149_v39, %v1397_v48  ;;  %1176 = vpow2.f32 %v971_v26  ;;  %v487_v48 = vpop.f32.mrf.mxu0  ;;  %v994_v21 = vmul.f32 -1.442695, %v1521_v4 }
  0xf9   : > { %v1153_v43 = vpop.eup %1152  ;;  %817 = vst.msk [vmem:[%s1465_s26 + $0x80] sm:$0xff] %vm800_vm2, %v784_v40  ;;  %v787_v50 = vmul.f32 %v1151_v42, %v1400_v49  ;;  %1178 = vpow2.f32 %v987_v31  ;;  %v567_v49 = vpop.f32.mrf.mxu1  ;;  %v1528_v10 = vadd.f32 %v1378_v33, %v487_v48 }
  0xfa   : > { %v1155_v55 = vpop.eup %1154  ;;  %804 = vst.msk [vmem:[%s1465_s26 + $0x18] sm:$0xff] %vm800_vm2, %v771_v45  ;;  %v770_v56 = vmul.f32 %v1153_v43, %v1404_v53  ;;  %1180 = vpow2.f32 %v974_v35  ;;  %v1535_v16 = vadd.f32 %v1378_v33, %v567_v49 }
  0xfb   : > { %v1157_v62 = vpop.eup %1156  ;;  %820 = vst.msk [vmem:[%s1465_s26 + $0x98] sm:$0xff] %vm800_vm2, %v787_v50  ;;  %v786_v63 = vmul.f32 %v1155_v55, %v1407_v54  ;;  %1182 = vpow2.f32 %v990_v41 }
  0xfc   : > { %v1159_v53 = vpop.eup %1158  ;;  %803 = vst.msk [vmem:[%s1465_s26 + $0x10] sm:$0xff] %vm800_vm2, %v770_v56  ;;  %v773_v5 = vmul.f32 %v1157_v62, %v1413_v60  ;;  %1184 = vpow2.f32 %v973_v46 }
  0xfd   : > { %v1161_v54 = vpop.eup %1160  ;;  %819 = vst.msk [vmem:[%s1465_s26 + $0x90] sm:$0xff] %vm800_vm2, %v786_v63  ;;  %v789_v12 = vmul.f32 %v1159_v53, %v1416_v61  ;;  %1186 = vpow2.f32 %v989_v51 }
  0xfe   : > { %v1163_v60 = vpop.eup %1162  ;;  %806 = vst.msk [vmem:[%s1465_s26 + $0x28] sm:$0xff] %vm800_vm2, %v773_v5  ;;  %v772_v17 = vmul.f32 %v1161_v54, %v1420_v1  ;;  %1188 = vpow2.f32 %v976_v57  ;;  %v977_v1 = vmul.f32 -1.442695, %v1528_v10 }
  0xff   : > { %v1165_v20 = vpop.eup %1164  ;;  %822 = vst.msk [vmem:[%s1465_s26 + $0xa8] sm:$0xff] %vm800_vm2, %v789_v12  ;;  %v788_v61 = vmul.f32 %v1163_v60, %v1423_v2  ;;  %1190 = vpow2.f32 %v992_v0  ;;  %v993_v2 = vmul.f32 -1.442695, %v1535_v16 }
 0x100   : > { %v1167_v33 = vpop.eup %1166  ;;  %805 = vst.msk [vmem:[%s1465_s26 + $0x20] sm:$0xff] %vm800_vm2, %v772_v17  ;;  %v775_v22 = vmul.f32 %v1165_v20, %v1429_v8  ;;  %1192 = vpow2.f32 %v975_v7 }
 0x101   : > { %v1169_v24 = vpop.eup %1168  ;;  %821 = vst.msk [vmem:[%s1465_s26 + $0xa0] sm:$0xff] %vm800_vm2, %v788_v61  ;;  %v791_v25 = vmul.f32 %v1167_v33, %v1432_v9  ;;  %1194 = vpow2.f32 %v991_v15 }
 0x102   : > { %v1171_v26 = vpop.eup %1170  ;;  %808 = vst.msk [vmem:[%s1465_s26 + $0x38] sm:$0xff] %vm800_vm2, %v775_v22  ;;  %v774_v28 = vmul.f32 %v1169_v24, %v1436_v13  ;;  %1196 = vpow2.f32 %v978_v19 }
 0x103   : > { %v1173_v8 = vpop.eup %1172  ;;  %824 = vst.msk [vmem:[%s1465_s26 + $0xb8] sm:$0xff] %vm800_vm2, %v791_v25  ;;  %v790_v29 = vmul.f32 %v1171_v26, %v1439_v14  ;;  %1198 = vpow2.f32 %v994_v21 }
 0x104   : > { %v1175_v31 = vpop.eup %1174  ;;  %807 = vst.msk [vmem:[%s1465_s26 + $0x30] sm:$0xff] %vm800_vm2, %v774_v28  ;;  %v681_v9 = vadd.f32 1.0, %v1173_v8  ;;  %1200 = vpow2.f32 %v977_v1 }
 0x105   : > { %v1177_v30 = vpop.eup %1176  ;;  %823 = vst.msk [vmem:[%s1465_s26 + $0xb0] sm:$0xff] %vm800_vm2, %v790_v29  ;;  %v697_v34 = vadd.f32 1.0, %v1175_v31  ;;  %1202 = vpow2.f32 %v993_v2 }
 0x106   : > { %v1179_v36 = vpop.eup %1178  ;;  %1204 = vrcp.f32 %v681_v9  ;;  %v680_v13 = vadd.f32 1.0, %v1177_v30 }
 0x107   : > { %v1181_v35 = vpop.eup %1180  ;;  %1206 = vrcp.f32 %v697_v34  ;;  %v696_v37 = vadd.f32 1.0, %v1179_v36 }
 0x108   : > { %v1183_v39 = vpop.eup %1182  ;;  %1208 = vrcp.f32 %v680_v13  ;;  %v683_v14 = vadd.f32 1.0, %v1181_v35 }
 0x109   : > { %v1185_v40 = vpop.eup %1184  ;;  %1210 = vrcp.f32 %v696_v37  ;;  %v699_v41 = vadd.f32 1.0, %v1183_v39 }
 0x10a   : > { %v1187_v42 = vpop.eup %1186  ;;  %1212 = vrcp.f32 %v683_v14  ;;  %v682_v45 = vadd.f32 1.0, %v1185_v40 }
 0x10b   : > { %v1189_v46 = vpop.eup %1188  ;;  %1214 = vrcp.f32 %v699_v41  ;;  %v698_v43 = vadd.f32 1.0, %v1187_v42 }
 0x10c   : > { %v1191_v50 = vpop.eup %1190  ;;  %1216 = vrcp.f32 %v682_v45  ;;  %v685_v51 = vadd.f32 1.0, %v1189_v46 }
 0x10d   : > { %v1193_v48 = vpop.eup %1192  ;;  %1218 = vrcp.f32 %v698_v43  ;;  %v701_v55 = vadd.f32 1.0, %v1191_v50 }
 0x10e   : > { %v1195_v56 = vpop.eup %1194  ;;  %1220 = vrcp.f32 %v685_v51  ;;  %v684_v57 = vadd.f32 1.0, %v1193_v48 }
 0x10f   : > { %v1197_v49 = vpop.eup %1196  ;;  %1222 = vrcp.f32 %v701_v55  ;;  %v700_v62 = vadd.f32 1.0, %v1195_v56 }
 0x110   : > { %v1199_v63 = vpop.eup %1198  ;;  %1224 = vrcp.f32 %v684_v57  ;;  %v687_v0 = vadd.f32 1.0, %v1197_v49 }
 0x111   : > { %v1201_v53 = vpop.eup %1200  ;;  %1226 = vrcp.f32 %v700_v62  ;;  %v703_v5 = vadd.f32 1.0, %v1199_v63 }
 0x112   : > { %v1203_v7 = vpop.eup %1202  ;;  %1228 = vrcp.f32 %v687_v0  ;;  %v686_v54 = vadd.f32 1.0, %v1201_v53 }
 0x113   : > { %v1205_v12 = vpop.eup %1204  ;;  %1230 = vrcp.f32 %v703_v5  ;;  %v702_v15 = vadd.f32 1.0, %v1203_v7 }
 0x114   : > { %v1207_v60 = vpop.eup %1206  ;;  %v777_v17 = vmul.f32 %v1205_v12, %v1445_v59  ;;  %1232 = vrcp.f32 %v686_v54 }
 0x115   : > { %v1209_v19 = vpop.eup %1208  ;;  %v793_v20 = vmul.f32 %v1207_v60, %v1448_v3  ;;  %1234 = vrcp.f32 %v702_v15 }
 0x116   : > { %v1211_v61 = vpop.eup %1210  ;;  %810 = vst.msk [vmem:[%s1465_s26 + $0x48] sm:$0xff] %vm800_vm2, %v777_v17  ;;  %v776_v21 = vmul.f32 %v1209_v19, %v1451_v6 }
 0x117   : > { %v1213_v33 = vpop.eup %1212  ;;  %826 = vst.msk [vmem:[%s1465_s26 + $0xc8] sm:$0xff] %vm800_vm2, %v793_v20  ;;  %v792_v22 = vmul.f32 %v1211_v61, %v1454_v11 }
 0x118   : > { %v1215_v1 = vpop.eup %1214  ;;  %809 = vst.msk [vmem:[%s1465_s26 + $0x40] sm:$0xff] %vm800_vm2, %v776_v21  ;;  %v779_v59 = vmul.f32 %v1213_v33, %v1458_v18 }
 0x119   : > { %v1217_v3 = vpop.eup %1216  ;;  %825 = vst.msk [vmem:[%s1465_s26 + $0xc0] sm:$0xff] %vm800_vm2, %v792_v22  ;;  %v795_v24 = vmul.f32 %v1215_v1, %v1469_v23 }
 0x11a   : > { %v1219_v25 = vpop.eup %1218  ;;  %812 = vst.msk [vmem:[%s1465_s26 + $0x58] sm:$0xff] %vm800_vm2, %v779_v59  ;;  %v778_v6 = vmul.f32 %v1217_v3, %v1474_v27 }
 0x11b   : > { %v1221_v2 = vpop.eup %1220  ;;  %828 = vst.msk [vmem:[%s1465_s26 + $0xd8] sm:$0xff] %vm800_vm2, %v795_v24  ;;  %v794_v11 = vmul.f32 %v1219_v25, %v1479_v32 }
 0x11c   : > { %v1223_v26 = vpop.eup %1222  ;;  %811 = vst.msk [vmem:[%s1465_s26 + $0x50] sm:$0xff] %vm800_vm2, %v778_v6  ;;  %v781_v18 = vmul.f32 %v1221_v2, %v1486_v38 }
 0x11d   : > { %v1225_v28 = vpop.eup %1224  ;;  %827 = vst.msk [vmem:[%s1465_s26 + $0xd0] sm:$0xff] %vm800_vm2, %v794_v11  ;;  %v797_v23 = vmul.f32 %v1223_v26, %v1493_v44 }
 0x11e   : > { %v1227_v27 = vpop.eup %1226  ;;  %814 = vst.msk [vmem:[%s1465_s26 + $0x68] sm:$0xff] %vm800_vm2, %v781_v18  ;;  %v780_v8 = vmul.f32 %v1225_v28, %v1500_v47 }
 0x11f   : > { %v1229_v32 = vpop.eup %1228  ;;  %830 = vst.msk [vmem:[%s1465_s26 + $0xe8] sm:$0xff] %vm800_vm2, %v797_v23  ;;  %v796_v29 = vmul.f32 %v1227_v27, %v1507_v52 }
 0x120   : > { %v1231_v38 = vpop.eup %1230  ;;  %813 = vst.msk [vmem:[%s1465_s26 + $0x60] sm:$0xff] %vm800_vm2, %v780_v8  ;;  %v783_v31 = vmul.f32 %v1229_v32, %v1514_v58 }
 0x121   : > { %v1233_v9 = vpop.eup %1232  ;;  %829 = vst.msk [vmem:[%s1465_s26 + $0xe0] sm:$0xff] %vm800_vm2, %v796_v29  ;;  %v799_v44 = vmul.f32 %v1231_v38, %v1521_v4 }
 0x122   : > { %v1235_v30 = vpop.eup %1234  ;;  %816 = vst.msk [vmem:[%s1465_s26 + $0x78] sm:$0xff] %vm800_vm2, %v783_v31  ;;  %v782_v47 = vmul.f32 %v1233_v9, %v1528_v10 }
 0x123   : > { %832 = vst.msk [vmem:[%s1465_s26 + $0xf8] sm:$0xff] %vm800_vm2, %v799_v44  ;;  %v798_v34 = vmul.f32 %v1235_v30, %v1535_v16 }
 0x124   : > { %815 = vst.msk [vmem:[%s1465_s26 + $0x70] sm:$0xff] %vm800_vm2, %v782_v47 }
 0x125   : > { %831 = vst.msk [vmem:[%s1465_s26 + $0xf0] sm:$0xff] %vm800_vm2, %v798_v34 }
 0x126 PF: > { %s13_s14 = sadd.s32 1, %s1258_s14   ;;  %s1624_s12 = smov %s1254_s13 }
 0x127   : > { %p10_p5 = scmp.ge.s32.totalorder %s13_s14, 6   ;;  %s1625_s13 = smov %s1627_s15 }
 0x129   :  { %12 = sbr.rel (!%p10_p5) target bundleno = 2 (0x2), region = 62 }

</bundles_post_ra>
